<compile_context>
chip_gen: v7x
topology: tpu7x:2x2x1
jax: 0.10.0
libtpu: 0.0.40
codegen_flags: <defaults>
</compile_context>

<pallas_src>
import jax
import jax.numpy as jnp
from jax import lax
from jax.experimental import pallas as pl
from jax.experimental.pallas import tpu as pltpu


# ----------------------------- helpers -------------------------------------

def _round_up(v, m):
    return ((v + m - 1) // m) * m


def _dtype_granule(dtype):
    """Sublane granule for the second-to-last dim (f32:8, bf16:16, int8/fp8:32)."""
    return 8 * (4 // jnp.dtype(dtype).itemsize)


def _pick_m_tile(m, granule, max_tm=512):
    """Balanced M tiling: per-tile padding waste < one granule."""
    max_tm = max(max_tm, granule)
    m_tiles = -(-m // max_tm)                  # ceil
    tm = _round_up(-(-m // m_tiles), granule)  # balanced tile, granule-aligned
    return tm, tm * m_tiles


def _largest_divisor_tile(dim, max_tile, multiple=128):
    """Largest t <= max_tile with t % multiple == 0 and dim % t == 0 (dim % multiple == 0)."""
    best = multiple
    t = multiple
    limit = min(dim, max_tile)
    while t <= limit:
        if dim % t == 0:
            best = t
        t += multiple
    return best


def _vmem_capacity_bytes():
    try:
        return int(pltpu.get_tpu_info().vmem_capacity_bytes)
    except Exception:
        return 64 * 1024 * 1024            # conservative (v7x physical per-TC)


def _default_budget(cap):
    # Per-step pipelined-buffer budget: generous on 128 MiB chips, safe on v7x 64 MiB.
    return min(int(cap * 0.6), 64 * 1024 * 1024)


def _vmem_limit(cap, footprint):
    return int(min(cap * 0.9, max(32 * 1024 * 1024, footprint * 1.5 + (2 << 20))))


# ----------------------------- kernels --------------------------------------
# Full-K variants: whole contraction in one block -> no scratch, no pl.when.

def _linear_full_kernel(x_ref, w_ref, o_ref):
    o_ref[...] = jnp.dot(x_ref[...], w_ref[...],
                         preferred_element_type=jnp.float32).astype(o_ref.dtype)


def _linear_full_bias_kernel(x_ref, w_ref, b_ref, o_ref):
    y = jnp.dot(x_ref[...], w_ref[...], preferred_element_type=jnp.float32)
    o_ref[...] = (y + b_ref[...]).astype(o_ref.dtype)


# K-tiled variants: f32 accumulator, bias folded into the k==0 init.

def _linear_ktiled_kernel(x_ref, w_ref, o_ref, acc_ref):
    k = pl.program_id(2)

    @pl.when(k == 0)
    def _():
        acc_ref[...] = jnp.zeros_like(acc_ref)

    acc_ref[...] += jnp.dot(x_ref[...], w_ref[...],
                            preferred_element_type=jnp.float32)

    @pl.when(k == pl.num_programs(2) - 1)
    def _():
        o_ref[...] = acc_ref[...].astype(o_ref.dtype)


def _linear_ktiled_bias_kernel(x_ref, w_ref, b_ref, o_ref, acc_ref):
    k = pl.program_id(2)

    @pl.when(k == 0)
    def _():
        acc_ref[...] = jnp.broadcast_to(b_ref[...], acc_ref.shape)

    acc_ref[...] += jnp.dot(x_ref[...], w_ref[...],
                            preferred_element_type=jnp.float32)

    @pl.when(k == pl.num_programs(2) - 1)
    def _():
        o_ref[...] = acc_ref[...].astype(o_ref.dtype)


# Fused  y = normalize(x @ W + b) * scale  (full out_dim resident for the reduction).

def _norm_epilogue(y, scale):
    ss = jnp.sum(y * y, axis=-1, keepdims=True)
    # F.normalize: y / max(||y||, 1e-12) == y * rsqrt(max(||y||^2, 1e-24))
    return y * (lax.rsqrt(jnp.maximum(ss, 1e-24)) * scale)


def _linear_norm_full_kernel(x_ref, w_ref, scale_ref, o_ref):
    y = jnp.dot(x_ref[...], w_ref[...], preferred_element_type=jnp.float32)
    o_ref[...] = _norm_epilogue(y, scale_ref[0]).astype(o_ref.dtype)


def _linear_norm_full_bias_kernel(x_ref, w_ref, b_ref, scale_ref, o_ref):
    y = jnp.dot(x_ref[...], w_ref[...], preferred_element_type=jnp.float32) + b_ref[...]
    o_ref[...] = _norm_epilogue(y, scale_ref[0]).astype(o_ref.dtype)


def _linear_norm_ktiled_kernel(x_ref, w_ref, scale_ref, o_ref, acc_ref):
    k = pl.program_id(1)

    @pl.when(k == 0)
    def _():
        acc_ref[...] = jnp.zeros_like(acc_ref)

    acc_ref[...] += jnp.dot(x_ref[...], w_ref[...],
                            preferred_element_type=jnp.float32)

    @pl.when(k == pl.num_programs(1) - 1)
    def _():
        o_ref[...] = _norm_epilogue(acc_ref[...], scale_ref[0]).astype(o_ref.dtype)


def _linear_norm_ktiled_bias_kernel(x_ref, w_ref, b_ref, scale_ref, o_ref, acc_ref):
    k = pl.program_id(1)

    @pl.when(k == 0)
    def _():
        acc_ref[...] = jnp.broadcast_to(b_ref[...], acc_ref.shape)

    acc_ref[...] += jnp.dot(x_ref[...], w_ref[...],
                            preferred_element_type=jnp.float32)

    @pl.when(k == pl.num_programs(1) - 1)
    def _():
        o_ref[...] = _norm_epilogue(acc_ref[...], scale_ref[0]).astype(o_ref.dtype)


# ----------------------------- wrappers --------------------------------------

def proj_linear(x, weight_t, bias=None, out_dim=None, out_dtype=None,
                vmem_budget_bytes=None):
    """y = x @ weight_t + bias.  weight_t is (K_pad, N_pad), pre-padded to 128s.
    bias (if any) is (1, N_pad) float32."""
    m, k = x.shape
    k_pad, n_pad = weight_t.shape
    out_dim = n_pad if out_dim is None else out_dim
    out_dtype = x.dtype if out_dtype is None else out_dtype

    dx = jnp.dtype(x.dtype).itemsize
    dw = jnp.dtype(weight_t.dtype).itemsize
    dout = jnp.dtype(out_dtype).itemsize

    cap = _vmem_capacity_bytes()
    budget = _default_budget(cap) if vmem_budget_bytes is None else int(vmem_budget_bytes)

    granule = max(_dtype_granule(x.dtype), _dtype_granule(out_dtype))
    tm, m_pad = _pick_m_tile(m, granule, max_tm=512)
    m_blocks = m_pad // tm
    # v7x has 2 TensorCores: if M collapses to one tile, split N instead.
    min_n_blocks = 2 if (m_blocks == 1 and n_pad >= 256) else 1
    n_cap = n_pad // min_n_blocks

    # Prefer full K per block (no accumulator; weight stays VMEM-resident when tn==n_pad).
    fixed_fullk = 2 * tm * k_pad * dx
    per_tn_fullk = 2 * k_pad * dw + 2 * tm * dout + tm * 4
    tn_budget = (budget - fixed_fullk) // per_tn_fullk if budget > fixed_fullk else 0
    full_k = tn_budget >= 128
    if full_k:
        tn = _largest_divisor_tile(n_pad, min(tn_budget, n_cap))
        tk = k_pad
    else:
        tn = _largest_divisor_tile(n_pad, min(n_cap, 512))
        fixed_kt = 2 * tm * tn * dout + tm * tn * 4 + 2 * tn * 4
        per_tk = 2 * (tm * dx + tn * dw)
        tk_budget = (budget - fixed_kt) // per_tk if budget > fixed_kt else 128
        tk = _largest_divisor_tile(k_pad, max(tk_budget, 128))

    if (m_pad, k_pad) != (m, k):
        x = jnp.pad(x, ((0, m_pad - m), (0, k_pad - k)))

    footprint = (2 * (tm * tk * dx + tk * tn * dw + tm * tn * dout)
                 + tm * tn * 4 + 2 * tn * 4)
    out_shape = jax.ShapeDtypeStruct((m_pad, n_pad), out_dtype)

    if full_k:
        params = pltpu.CompilerParams(
            dimension_semantics=("parallel", "parallel"),
            vmem_limit_bytes=_vmem_limit(cap, footprint))
        grid = (m_blocks, n_pad // tn)
        x_spec = pl.BlockSpec((tm, k_pad), lambda i, j: (i, 0))
        w_spec = pl.BlockSpec((k_pad, tn), lambda i, j: (0, j))
        o_spec = pl.BlockSpec((tm, tn), lambda i, j: (i, j))
        if bias is None:
            y = pl.pallas_call(_linear_full_kernel, grid=grid,
                               in_specs=[x_spec, w_spec], out_specs=o_spec,
                               out_shape=out_shape,
                               compiler_params=params)(x, weight_t)
        else:
            b_spec = pl.BlockSpec((1, tn), lambda i, j: (0, j))
            y = pl.pallas_call(_linear_full_bias_kernel, grid=grid,
                               in_specs=[x_spec, w_spec, b_spec], out_specs=o_spec,
                               out_shape=out_shape,
                               compiler_params=params)(x, weight_t, bias)
    else:
        params = pltpu.CompilerParams(
            dimension_semantics=("parallel", "parallel", "arbitrary"),
            vmem_limit_bytes=_vmem_limit(cap, footprint))
        grid = (m_blocks, n_pad // tn, k_pad // tk)
        x_spec = pl.BlockSpec((tm, tk), lambda i, j, kk: (i, kk))
        w_spec = pl.BlockSpec((tk, tn), lambda i, j, kk: (kk, j))
        o_spec = pl.BlockSpec((tm, tn), lambda i, j, kk: (i, j))
        scratch = [pltpu.VMEM((tm, tn), jnp.float32)]
        if bias is None:
            y = pl.pallas_call(_linear_ktiled_kernel, grid=grid,
                               in_specs=[x_spec, w_spec], out_specs=o_spec,
                               out_shape=out_shape, scratch_shapes=scratch,
                               compiler_params=params)(x, weight_t)
        else:
            b_spec = pl.BlockSpec((1, tn), lambda i, j, kk: (0, j))
            y = pl.pallas_call(_linear_ktiled_bias_kernel, grid=grid,
                               in_specs=[x_spec, w_spec, b_spec], out_specs=o_spec,
                               out_shape=out_shape, scratch_shapes=scratch,
                               compiler_params=params)(x, weight_t, bias)

    if (m_pad, n_pad) != (m, out_dim):
        y = y[:m, :out_dim]
    return y


def proj_linear_norm(x, weight_t, bias, scale, out_dim=None, out_dtype=None,
                     vmem_budget_bytes=None):
    """y = F.normalize(x @ weight_t + bias, dim=-1, eps=1e-12) * scale (fused)."""
    m, k = x.shape
    k_pad, n_pad = weight_t.shape
    out_dim = n_pad if out_dim is None else out_dim
    out_dtype = x.dtype if out_dtype is None else out_dtype

    dx = jnp.dtype(x.dtype).itemsize
    dw = jnp.dtype(weight_t.dtype).itemsize
    dout = jnp.dtype(out_dtype).itemsize

    cap = _vmem_capacity_bytes()
    budget = _default_budget(cap) if vmem_budget_bytes is None else int(vmem_budget_bytes)

    granule = max(_dtype_granule(x.dtype), _dtype_granule(out_dtype))
    # Full padded out_dim stays resident for the row reduction -> cap tm so the
    # f32 accumulator + double-buffered output stay inside the budget (v7x 64 MiB).
    tm_cap = budget // (2 * n_pad * (4 + 2 * dout))
    tm_cap = max(granule, (tm_cap // granule) * granule)
    tm, m_pad = _pick_m_tile(m, granule, max_tm=min(512, tm_cap))
    m_blocks = m_pad // tm

    fullk_footprint = (2 * (tm * k_pad * dx + k_pad * n_pad * dw + tm * n_pad * dout)
                       + tm * n_pad * 4 + 2 * n_pad * 4)
    full_k = fullk_footprint <= budget
    if full_k:
        tk = k_pad
        footprint = fullk_footprint
    else:
        fixed = 2 * tm * n_pad * dout + tm * n_pad * 4 + 2 * n_pad * 4
        per_tk = 2 * (tm * dx + n_pad * dw)
        tk_budget = (budget - fixed) // per_tk if budget > fixed else 128
        tk = _largest_divisor_tile(k_pad, max(tk_budget, 128))
        footprint = fixed + per_tk * tk

    if (m_pad, k_pad) != (m, k):
        x = jnp.pad(x, ((0, m_pad - m), (0, k_pad - k)))

    scale_arr = jnp.asarray(scale, jnp.float32).reshape(1)
    s_spec = pl.BlockSpec(memory_space=pltpu.MemorySpace.SMEM)
    out_shape = jax.ShapeDtypeStruct((m_pad, n_pad), out_dtype)

    if full_k:
        params = pltpu.CompilerParams(
            dimension_semantics=("parallel",),
            vmem_limit_bytes=_vmem_limit(cap, footprint))
        grid = (m_blocks,)
        x_spec = pl.BlockSpec((tm, k_pad), lambda i: (i, 0))
        w_spec = pl.BlockSpec((k_pad, n_pad), lambda i: (0, 0))
        o_spec = pl.BlockSpec((tm, n_pad), lambda i: (i, 0))
        if bias is None:
            y = pl.pallas_call(_linear_norm_full_kernel, grid=grid,
                               in_specs=[x_spec, w_spec, s_spec], out_specs=o_spec,
                               out_shape=out_shape,
                               compiler_params=params)(x, weight_t, scale_arr)
        else:
            b_spec = pl.BlockSpec((1, n_pad), lambda i: (0, 0))
            y = pl.pallas_call(_linear_norm_full_bias_kernel, grid=grid,
                               in_specs=[x_spec, w_spec, b_spec, s_spec],
                               out_specs=o_spec, out_shape=out_shape,
                               compiler_params=params)(x, weight_t, bias, scale_arr)
    else:
        params = pltpu.CompilerParams(
            dimension_semantics=("parallel", "arbitrary"),
            vmem_limit_bytes=_vmem_limit(cap, footprint))
        grid = (m_blocks, k_pad // tk)
        x_spec = pl.BlockSpec((tm, tk), lambda i, kk: (i, kk))
        w_spec = pl.BlockSpec((tk, n_pad), lambda i, kk: (kk, 0))
        o_spec = pl.BlockSpec((tm, n_pad), lambda i, kk: (i, 0))
        scratch = [pltpu.VMEM((tm, n_pad), jnp.float32)]
        if bias is None:
            y = pl.pallas_call(_linear_norm_ktiled_kernel, grid=grid,
                               in_specs=[x_spec, w_spec, s_spec], out_specs=o_spec,
                               out_shape=out_shape, scratch_shapes=scratch,
                               compiler_params=params)(x, weight_t, scale_arr)
        else:
            b_spec = pl.BlockSpec((1, n_pad), lambda i, kk: (0, 0))
            y = pl.pallas_call(_linear_norm_ktiled_bias_kernel, grid=grid,
                               in_specs=[x_spec, w_spec, b_spec, s_spec],
                               out_specs=o_spec, out_shape=out_shape,
                               scratch_shapes=scratch,
                               compiler_params=params)(x, weight_t, bias, scale_arr)

    if (m_pad, n_pad) != (m, out_dim):
        y = y[:m, :out_dim]
    return y


# ------------------------------- module --------------------------------------

class Proj:
    """JAX/Pallas mirror of the PyTorch `Proj` module.

    The Linear weight is stored pre-transposed (in_dim, out_dim), zero-padded once
    to multiples of 128, and cast to `param_dtype` (bf16 by default -> bf16 MXU
    operands, f32 accumulation, output in the input dtype).  Bias stays f32.
    """

    def __init__(self, in_dim, out_dim, norm, scaler, bias=True, key=None,
                 param_dtype=jnp.bfloat16):
        key = jax.random.PRNGKey(0) if key is None else key
        kw, kb = jax.random.split(key)
        bound = 1.0 / (in_dim ** 0.5)          # nn.Linear default init family
        w = jax.random.uniform(kw, (out_dim, in_dim), jnp.float32, -bound, bound)

        k_pad = _round_up(in_dim, 128)
        n_pad = _round_up(out_dim, 128)
        self.weight_t = jnp.pad(
            w.T, ((0, k_pad - in_dim), (0, n_pad - out_dim))).astype(param_dtype)
        if bias:
            b = jax.random.uniform(kb, (out_dim,), jnp.float32, -bound, bound)
            self.bias = jnp.pad(b, (0, n_pad - out_dim)).astype(
                jnp.float32).reshape(1, n_pad)
        else:
            self.bias = None

        self.in_dim, self.out_dim = in_dim, out_dim
        self.norm, self.scaler = norm, scaler
        if norm and scaler is not None:
            self.scale = jnp.array([float(scaler)], jnp.float32)

    def __call__(self, x):
        lead = x.shape[:-1]
        out_dtype = x.dtype
        x2 = x.reshape(-1, self.in_dim).astype(self.weight_t.dtype)
        if self.norm and self.scaler is None:
            # Mirrors PyTorch exactly: this branch references self.scale, which only
            # exists when scaler is not None -> AttributeError, same as the original.
            y = proj_linear_norm(x2, self.weight_t, self.bias, self.scale,
                                 out_dim=self.out_dim, out_dtype=out_dtype)
        else:
            y = proj_linear(x2, self.weight_t, self.bias,
                            out_dim=self.out_dim, out_dtype=out_dtype)
        return y.reshape(*lead, self.out_dim)


# --------------------------------- test ---------------------------------------

if __name__ == "__main__":
    key = jax.random.PRNGKey(0)
    kx, kp, kx2, kp2 = jax.random.split(key, 4)

    # --- Test group A: small f32 head, single tile, bias, norm kernels -----------
    M, IN_DIM, OUT_DIM = 8, 32, 64
    x = jax.random.normal(kx, (M, IN_DIM), jnp.float32)
    proj = Proj(IN_DIM, OUT_DIM, norm=True, scaler=2.0, bias=True, key=kp,
                param_dtype=jnp.float32)
    y = jax.block_until_ready(proj(x))

    w_a = proj.weight_t[:IN_DIM, :OUT_DIM]
    b_a = proj.bias[0, :OUT_DIM]
    y_ref = x @ w_a + b_a
    assert y.shape == (M, OUT_DIM)
    assert jnp.allclose(y, y_ref, atol=1e-5, rtol=1e-5), "f32 linear+bias mismatch"

    y_nb = jax.block_until_ready(proj_linear(x, proj.weight_t, None, out_dim=OUT_DIM))
    assert jnp.allclose(y_nb, x @ w_a, atol=1e-5, rtol=1e-5), "f32 linear mismatch"

    def _norm_ref(yv, s):
        nrm = jnp.sqrt(jnp.sum(yv * yv, axis=-1, keepdims=True))
        return yv / jnp.maximum(nrm, 1e-12) * s

    yn = jax.block_until_ready(
        proj_linear_norm(x, proj.weight_t, proj.bias, 2.0, out_dim=OUT_DIM))
    assert jnp.allclose(yn, _norm_ref(y_ref, 2.0), atol=1e-3, rtol=1e-3), \
        "fused normalize (bias) mismatch"

    yn2 = jax.block_until_ready(
        proj_linear_norm(x, proj.weight_t, None, 1.5, out_dim=OUT_DIM))
    assert jnp.allclose(yn2, _norm_ref(x @ w_a, 1.5), atol=1e-3, rtol=1e-3), \
        "fused normalize mismatch"

    # --- Test group B: bf16 params, M padding, multi N-block, K-tiled fallback ---
    M2, IN2, OUT2 = 10, 640, 384
    x2 = jax.random.normal(kx2, (M2, IN2), jnp.float32)
    proj2 = Proj(IN2, OUT2, norm=False, scaler=None, bias=True, key=kp2)  # bf16 default
    y2 = jax.block_until_ready(proj2(x2))

    x2b = x2.astype(jnp.bfloat16)
    w_b = proj2.weight_t[:IN2, :OUT2].astype(jnp.float32)
    b_b = proj2.bias[0, :OUT2]
    y2_ref = x2b.astype(jnp.float32) @ w_b + b_b
    assert y2.shape == (M2, OUT2)
    assert jnp.allclose(y2, y2_ref, atol=1e-2, rtol=1e-2), "bf16 linear+bias mismatch"

    # Force the K-tiled accumulator path with a tiny artificial VMEM budget.
    y2k = jax.block_until_ready(
        proj_linear(x2b, proj2.weight_t, proj2.bias, out_dim=OUT2,
                    out_dtype=jnp.float32, vmem_budget_bytes=256 * 1024))
    assert jnp.allclose(y2k, y2_ref, atol=1e-2, rtol=1e-2), "K-tiled bias mismatch"

    y2k_nb = jax.block_until_ready(
        proj_linear(x2b, proj2.weight_t, None, out_dim=OUT2,
                    out_dtype=jnp.float32, vmem_budget_bytes=256 * 1024))
    assert jnp.allclose(y2k_nb, x2b.astype(jnp.float32) @ w_b,
                        atol=1e-2, rtol=1e-2), "K-tiled mismatch"

    # Force the K-tiled fused-normalize path as well.
    ynk = jax.block_until_ready(
        proj_linear_norm(x2b, proj2.weight_t, proj2.bias, 1.0, out_dim=OUT2,
                         out_dtype=jnp.float32, vmem_budget_bytes=256 * 1024))
    assert jnp.allclose(ynk, _norm_ref(y2_ref, 1.0), atol=2e-3, rtol=2e-3), \
        "K-tiled normalize (bias) mismatch"

    ynk_nb = jax.block_until_ready(
        proj_linear_norm(x2b, proj2.weight_t, None, 2.0, out_dim=OUT2,
                         out_dtype=jnp.float32, vmem_budget_bytes=256 * 1024))
    assert jnp.allclose(ynk_nb, _norm_ref(x2b.astype(jnp.float32) @ w_b, 2.0),
                        atol=2e-3, rtol=2e-3), "K-tiled normalize mismatch"

    print("KERNEL_OK")
</pallas_src>

<mosaic_0001>
module attributes {stable_mosaic.version = 11 : i64} {
  func.func @_linear_full_bias_kernel(%arg0: i32, %arg1: i32, %arg2: memref<8x128xf32, #tpu.memory_space<vmem>>, %arg3: memref<128x128xf32, #tpu.memory_space<vmem>>, %arg4: memref<1x128xf32, #tpu.memory_space<vmem>>, %arg5: memref<8x128xf32, #tpu.memory_space<vmem>>) attributes {dimension_semantics = [#tpu.dimension_semantics<parallel>, #tpu.dimension_semantics<parallel>], iteration_bounds = array<i64: 1, 1>, scalar_prefetch = 0 : i64, scratch_operands = 0 : i64, tpu.core_type = #tpu.core_type<tc>, window_params = [{transform_indices = @transform_0, window_bounds = array<i64: 8, 128>}, {transform_indices = @transform_1, window_bounds = array<i64: 128, 128>}, {transform_indices = @transform_2, window_bounds = array<i64: 1, 128>}, {transform_indices = @transform_3, window_bounds = array<i64: 8, 128>}]} {
    %c0 = arith.constant 0 : index
    %c0_0 = arith.constant 0 : index
    %0 = vector.load %arg2[%c0, %c0_0] : memref<8x128xf32, #tpu.memory_space<vmem>>, vector<8x128xf32>
    %c0_1 = arith.constant 0 : index
    %c0_2 = arith.constant 0 : index
    %1 = vector.load %arg3[%c0_1, %c0_2] : memref<128x128xf32, #tpu.memory_space<vmem>>, vector<128x128xf32>
    %cst = arith.constant dense<0.000000e+00> : vector<8x128xf32>
    %2 = tpu.matmul %0, %1, %cst {dimension_numbers = #tpu.dot_dimension_numbers<[1], [0], [0], [1], [0, 0, 1, 1], [], []>} : vector<8x128xf32>, vector<128x128xf32>, vector<8x128xf32> -> vector<8x128xf32>
    %c0_3 = arith.constant 0 : index
    %c0_4 = arith.constant 0 : index
    %3 = vector.load %arg4[%c0_3, %c0_4] : memref<1x128xf32, #tpu.memory_space<vmem>>, vector<1x128xf32>
    %4 = vector.broadcast %3 : vector<1x128xf32> to vector<8x128xf32>
    %5 = arith.addf %2, %4 : vector<8x128xf32>
    %c0_5 = arith.constant 0 : index
    %c0_6 = arith.constant 0 : index
    %6 = vector.load %arg5[%c0_5, %c0_6] : memref<8x128xf32, #tpu.memory_space<vmem>>, vector<8x128xf32>
    tpu.vector_store %arg5[%c0_5, %c0_6], %5 {strides = array<i32>} : memref<8x128xf32, #tpu.memory_space<vmem>>, vector<8x128xf32>,
    return
  }
  func.func @transform_0(%arg0: i32, %arg1: i32) -> (i32, i32) {
    %c0_i32 = arith.constant 0 : i32
    %c0_i32_0 = arith.constant 0 : i32
    return %arg0, %c0_i32 : i32, i32
  }
  func.func @transform_1(%arg0: i32, %arg1: i32) -> (i32, i32) {
    %c0_i32 = arith.constant 0 : i32
    %c0_i32_0 = arith.constant 0 : i32
    return %c0_i32, %arg1 : i32, i32
  }
  func.func @transform_2(%arg0: i32, %arg1: i32) -> (i32, i32) {
    %c0_i32 = arith.constant 0 : i32
    %c0_i32_0 = arith.constant 0 : i32
    return %c0_i32, %arg1 : i32, i32
  }
  func.func @transform_3(%arg0: i32, %arg1: i32) -> (i32, i32) {
    %c0_i32 = arith.constant 0 : i32
    return %arg0, %arg1 : i32, i32
  }
}

</mosaic_0001>

<bundles_post_ra>
// kernel: tpu_custom_call.1
= control target key start
LH: loop header
LB: loop body
LE: loop exit
PB: predicated region body
PF: predicated region fallthrough
CT: control target
= control target key end

     0   :  { %8 = vsyncpa [#allocation3], 0  ;;  %s383_s0 = inlined_call_operand.hbm [shape: f32[8,128], index: 0, kind: input, shape index: {}]   ;;  %s384_s1 = inlined_call_operand.hbm [shape: f32[128,128], index: 1, kind: input, shape index: {}]   ;;  %s385_s2 = inlined_call_operand.vmem [shape: f32[1,128], index: 2, kind: input, shape index: {}]   ;;  %s386_s3 = inlined_call_operand.hbm [shape: f32[8,128], index: 3, kind: output, shape index: {}]  }
   0x1   :  { %9 = vsyncpa [#allocation6], 0 }
   0x2   :  { %10 = vsyncpa [#allocation4], 0  ;;  %s309_s12 = smov [#allocation2]   ;;  %s310_s14 = smov [#allocation5]  }
   0x3   :  { %s17_s13 = sshll.u32 %s309_s12, 4  ;;  %s26_s15 = sshll.u32 %s310_s14, 4  ;;  %s18_s13 = int_to_ptr.vmem [resolvable:$true] %s17_s13  ;;  %s337_s15 = int_to_ptr.vmem [resolvable:$true] %s26_s15 }
   0x4   :  { %s237_s18 = scalar_lea.hbm %s383_s0, 128 }
   0x5   :  { %p238_p0 = scmp.ne.s32.totalorder %s383_s0, %s237_s18  ;;  %p241_p1 = scmp.lt.u32.totalorder %s237_s18, %s383_s0 }
   0x7   :  { %p243_p2 = pnand %p241_p1, %p238_p0 }
   0x9   :  { %246 = shalt.err (!%p243_p2)
}
   0xa   :  { %s247_s23 = scalar_lea.vmem %s18_s13, 128  ;;  %p252_p4 = scmp.lt.s32.totalorder %s18_s13, %s18_s13 }
   0xb   :  { %p248_p3 = scmp.ne.s32.totalorder %s18_s13, %s247_s23  ;;  %p253_p5 = scmp.lt.s32.totalorder %s247_s23, %s247_s23 }
   0xd   :  { %p254_p6 = por %p253_p5, %p252_p4 }
   0xf   :  { %p255_p7 = pnand %p254_p6, %p248_p3 }
  0x11   :  { %258 = shalt.err (!%p255_p7)
}
  0x12   :  { %20 = dma.hbm_to_vmem [thread:$0]  %s383_s0, 128, %s18_s13, [#allocation3]  }
  0x13   :  { %s259_s28 = scalar_lea.hbm %s384_s1, 2048 }
  0x14   :  { %p260_p8 = scmp.ne.s32.totalorder %s384_s1, %s259_s28  ;;  %p263_p9 = scmp.lt.u32.totalorder %s259_s28, %s384_s1 }
  0x16   :  { %p265_p10 = pnand %p263_p9, %p260_p8 }
  0x18   :  { %268 = shalt.err (!%p265_p10)
}
  0x19   :  { %s269_s6 = scalar_lea.vmem %s337_s15, 2048  ;;  %p274_p12 = scmp.lt.s32.totalorder %s337_s15, %s337_s15 }
  0x1a   :  { %p270_p11 = scmp.ne.s32.totalorder %s337_s15, %s269_s6  ;;  %p275_p13 = scmp.lt.s32.totalorder %s269_s6, %s269_s6 }
  0x1c   :  { %p276_p0 = por %p275_p13, %p274_p12 }
  0x1e   :  { %p277_p1 = pnand %p276_p0, %p270_p11 }
  0x20   :  { %280 = shalt.err (!%p277_p1)
}
  0x21   :  { %s311_s0 = smov 128   ;;  %s312_s7 = smov 8  }
  0x22   :  { %32 = dma.hbm_to_vmem [thread:$0]  %s384_s1, 2048, %s337_s15, [#allocation6], %s311_s0, %s311_s0, %s312_s7  }
  0x23   :  { %303 = dma.done.wait [#allocation3], 128  }
  0x24   :  { %304 = vsyncadd [#allocation3], 4294967168 }
  0x25   :  { %305 = dma.done.wait [#allocation6], 2048  }
  0x26   :  { %306 = vsyncadd [#allocation6], 4294965248  ;;  %v313_v0 = vmov 0.0|0.0   ;;  %vm314_vm0 = vmmov 0   ;;  %v315_v1 = vmov 0.0   ;;  %v42_v2 = vld [vmem:[#allocation5] sm:$0xff] }
  0x27   :  { %205 = vmatprep.subr.bf16.mxu0 %v313_v0  ;;  %202 = vmatprep.mubr.msk.f32.mxu0 %vm314_vm0, %v315_v1  ;;  %v43_v3 = vld [vmem:[#allocation5 + $0x8] sm:$0xff]  ;;  %v44_v4 = vld [vmem:[#allocation5 + $0x10] sm:$0xff]  ;;  %v45_v6 = vld [vmem:[#allocation5 + $0x18] sm:$0xff]  ;;  %s316_s11 = smov [#allocation7]  }
  0x28   :  { %v206_v5 = vpack.c.bf16 %v43_v3, %v42_v2  ;;  %v209_v7 = vpack.c.bf16 %v45_v6, %v44_v4  ;;  %v46_v8 = vld [vmem:[#allocation5 + $0x20] sm:$0xff]  ;;  %v47_v9 = vld [vmem:[#allocation5 + $0x28] sm:$0xff]  ;;  %v48_v11 = vld [vmem:[#allocation5 + $0x30] sm:$0xff]  ;;  %s142_s12 = sshll.u32 %s316_s11, 4  ;;  %s143_s12 = int_to_ptr.vmem [resolvable:$true] %s142_s12 }
  0x29   :  { %v212_v10 = vpack.c.bf16 %v47_v9, %v46_v8  ;;  %v49_v12 = vld [vmem:[#allocation5 + $0x38] sm:$0xff]  ;;  %v50_v14 = vld [vmem:[#allocation5 + $0x40] sm:$0xff]  ;;  %v51_v15 = vld [vmem:[#allocation5 + $0x48] sm:$0xff]  ;;  %s281_s13 = scalar_lea.vmem %s143_s12, 128  ;;  %p286_p3 = scmp.lt.s32.totalorder %s143_s12, %s143_s12 }
  0x2a   :  { %207 = vmatpush3.bf16.msra.mxu0 %v206_v5  ;;  %v215_v13 = vpack.c.bf16 %v49_v12, %v48_v11  ;;  %v218_v16 = vpack.c.bf16 %v51_v15, %v50_v14  ;;  %v52_v17 = vld [vmem:[#allocation5 + $0x50] sm:$0xff]  ;;  %v53_v18 = vld [vmem:[#allocation5 + $0x58] sm:$0xff]  ;;  %v54_v20 = vld [vmem:[#allocation5 + $0x60] sm:$0xff]  ;;  %p282_p2 = scmp.ne.s32.totalorder %s143_s12, %s281_s13  ;;  %p287_p4 = scmp.lt.s32.totalorder %s281_s13, %s281_s13 }
  0x2b   :  { %208 = vmatprep.subr.bf16.mxu0 %v313_v0  ;;  %v221_v19 = vpack.c.bf16 %v53_v18, %v52_v17  ;;  %v55_v21 = vld [vmem:[#allocation5 + $0x68] sm:$0xff]  ;;  %v56_v23 = vld [vmem:[#allocation5 + $0x70] sm:$0xff]  ;;  %v57_v24 = vld [vmem:[#allocation5 + $0x78] sm:$0xff] }
  0x2c   :  { %v224_v22 = vpack.c.bf16 %v55_v21, %v54_v20  ;;  %v227_v25 = vpack.c.bf16 %v57_v24, %v56_v23  ;;  %v41_v26 = vld [vmem:[#allocation2] sm:$0xff]  ;;  %p288_p5 = por %p287_p4, %p286_p3 }
  0x2d   :  { %v152_v27 = vld [vmem:[%s385_s2] ss:$0 sm:$0xff] }
  0x2e   :  { %210 = vmatpush3.bf16.msra.mxu0 %v209_v7  ;;  %p289_p6 = pnand %p288_p5, %p282_p2 }
  0x2f   :  { %211 = vmatprep.subr.bf16.mxu0 %v313_v0 }
  0x32   :  { %213 = vmatpush3.bf16.msra.mxu0 %v212_v10 }
  0x33   :  { %214 = vmatprep.subr.bf16.mxu0 %v313_v0 }
  0x36   :  { %216 = vmatpush3.bf16.msra.mxu0 %v215_v13 }
  0x37   :  { %217 = vmatprep.subr.bf16.mxu0 %v313_v0 }
  0x3a   :  { %219 = vmatpush3.bf16.msra.mxu0 %v218_v16 }
  0x3b   :  { %220 = vmatprep.subr.bf16.mxu0 %v313_v0 }
  0x3e   :  { %222 = vmatpush3.bf16.msra.mxu0 %v221_v19 }
  0x3f   :  { %223 = vmatprep.subr.bf16.mxu0 %v313_v0 }
  0x42   :  { %225 = vmatpush3.bf16.msra.mxu0 %v224_v22 }
  0x43   :  { %226 = vmatprep.subr.bf16.mxu0 %v313_v0 }
  0x46   :  { %228 = vmatpush3.bf16.msra.mxu0 %v227_v25 }
  0x49   :  { %203 = vmatmul.mubr.f32.vlgmr.msra.gmra.mrb[0].mxu0 %v41_v26 }
 0x11c   :  { %v131_v28 = vpop.f32.mrb[0].mxu0 }
 0x11d   :  { %v132_v29 = vadd.f32 %v152_v27, %v131_v28  ;;  %v204_v30 = vpop.f32.mrb[1].mxu0 }
 0x11f   :  { %135 = vst [vmem:[#allocation7] sm:$0xff] %v132_v29 }
 0x120   :  { %292 = shalt.err (!%p289_p6)
}
 0x121   :  { %s293_s16 = scalar_lea.hbm %s386_s3, 128 }
 0x122   :  { %p294_p7 = scmp.ne.s32.totalorder %s386_s3, %s293_s16  ;;  %p297_p8 = scmp.lt.u32.totalorder %s293_s16, %s386_s3 }
 0x124   :  { %p299_p9 = pnand %p297_p8, %p294_p7 }
 0x126   :  { %302 = shalt.err (!%p299_p9)
}
 0x127   :  { %145 = dma.vmem_to_hbm [thread:$0]  %s143_s12, 128, %s386_s3, [#allocation4]  }
 0x128   :  { %307 = dma.done.wait [#allocation4], 128  }
 0x129   :  { %308 = vsyncadd [#allocation4], 4294967168 }
 0x12a   :  { %149 = vsyncpa [#allocation3], 1 }
 0x12b   :  { %150 = vsyncpa [#allocation6], 1 }
 0x12c   :  { %151 = vsyncpa [#allocation4], 1 }

</bundles_post_ra>
